<compile_context>
chip_gen: v6e
topology: v6e:2x2x1
jax: 0.10.0
libtpu: 0.0.40
codegen_flags: <defaults>
</compile_context>

<pallas_src>
import jax
import jax.numpy as jnp
from jax.experimental import pallas as pl
from jax.experimental.pallas import tpu as pltpu
from typing import NamedTuple

LANE = 128  # last block dim multiple (vreg lanes)


def _round_up(x, m):
    return ((x + m - 1) // m) * m


def _cdiv(a, b):
    return -(-a // b)


def _sublane_multiple(dtype):
    # rows per packed sublane tile: f32 -> 8, bf16 -> 16, int8/fp8 -> 32
    return max(8, 32 // jnp.dtype(dtype).itemsize)


def _vmem_budget_bytes():
    # Generation-aware cap: ~80% of physical per-core VMEM so the compiler
    # keeps headroom for internal scratch / semaphores.
    # v5e/v6e (128 MiB) -> ~102 MiB, v7x (64 MiB) -> ~51 MiB.
    try:
        cap = int(pltpu.get_tpu_info().vmem_capacity_bytes)
    except Exception:
        cap = 128 << 20
    return int(cap * 0.8)


# ----------------------------------------------------------------------------
# Kernels
# ----------------------------------------------------------------------------
def _mlp_kernel_resident(x_ref, w1t_ref, b1_ref, w2t_ref, b2_ref, o_ref):
    # fc1: (tb, in_p) @ (in_p, hid_p) -> f32 accumulation on the MXU
    h = jnp.dot(x_ref[...], w1t_ref[...], preferred_element_type=jnp.float32)
    h = jnp.maximum(h + b1_ref[...], 0.0)              # bias + ReLU in f32 (VPU)
    # fc2: (tb, hid_p) @ (hid_p, out_p)
    y = jnp.dot(h.astype(w2t_ref.dtype), w2t_ref[...],
                preferred_element_type=jnp.float32)
    o_ref[...] = (y + b2_ref[...]).astype(o_ref.dtype)


def _mlp_kernel_hid_tiled(x_ref, w1t_ref, b1_ref, w2t_ref, b2_ref, o_ref,
                          acc_ref):
    # hid axis is fc1's N and fc2's K; ReLU is elementwise over hid, so
    # per-hid-block compute + accumulate over blocks is exact.
    k = pl.program_id(1)

    @pl.when(k == 0)
    def _():
        acc_ref[...] = jnp.zeros_like(acc_ref)

    h = jnp.dot(x_ref[...], w1t_ref[...], preferred_element_type=jnp.float32)
    h = jnp.maximum(h + b1_ref[...], 0.0)
    acc_ref[...] += jnp.dot(h.astype(w2t_ref.dtype), w2t_ref[...],
                            preferred_element_type=jnp.float32)

    @pl.when(k == pl.num_programs(1) - 1)
    def _():
        o_ref[...] = (acc_ref[...] + b2_ref[...]).astype(o_ref.dtype)


# ----------------------------------------------------------------------------
# Parameter preparation (hoisted out of the per-call hot path)
# ----------------------------------------------------------------------------
class PreparedMLP(NamedTuple):
    w1t: jax.Array   # (in_p, hid_p), compute dtype, pre-transposed
    b1: jax.Array    # (1, hid_p), f32
    w2t: jax.Array   # (hid_p, out_p), compute dtype, pre-transposed
    b2: jax.Array    # (1, out_p), f32
    in_dim: int
    hid_dim: int
    out_dim: int
    in_p: int
    hid_p: int
    out_p: int
    compute_dtype: jnp.dtype


def prepare_mlp_params(w1, b1, w2, b2, *, compute_dtype=jnp.bfloat16):
    """Pad / cast / transpose the Linear weights once.

    w1: (hid, in), b1: (hid,), w2: (out, hid), b2: (out,) -- PyTorch layout.
    """
    hid_dim, in_dim = w1.shape
    out_dim = w2.shape[0]
    in_p = _round_up(in_dim, LANE)
    hid_p = _round_up(hid_dim, LANE)
    out_p = _round_up(out_dim, LANE)
    cdt = jnp.dtype(compute_dtype)

    # Zero padding keeps the math exact: padded input columns are 0, padded
    # hidden units have 0 weight + 0 bias -> ReLU(0)=0 -> no contribution, and
    # padded output columns / batch rows are sliced off in mlp_apply.
    w1t = jnp.pad(w1, ((0, hid_p - hid_dim), (0, in_p - in_dim))).astype(cdt).T
    w2t = jnp.pad(w2, ((0, out_p - out_dim), (0, hid_p - hid_dim))).astype(cdt).T
    b1p = jnp.pad(b1.astype(jnp.float32), (0, hid_p - hid_dim)).reshape(1, hid_p)
    b2p = jnp.pad(b2.astype(jnp.float32), (0, out_p - out_dim)).reshape(1, out_p)
    return PreparedMLP(w1t, b1p, w2t, b2p, in_dim, hid_dim, out_dim,
                       in_p, hid_p, out_p, cdt)


# ----------------------------------------------------------------------------
# Forward
# ----------------------------------------------------------------------------
def mlp_apply(params: PreparedMLP, x, *, block_b=256, block_hid=512,
              out_dtype=jnp.float32, force_hid_tiling=False):
    """ReLU(x @ w1.T + b1) @ w2.T + b2, using pre-padded params."""
    B, in_dim = x.shape
    assert in_dim == params.in_dim
    cdt = params.compute_dtype
    itm = cdt.itemsize
    out_itm = jnp.dtype(out_dtype).itemsize
    in_p, hid_p, out_p = params.in_p, params.hid_p, params.out_p

    # ---- batch tiling (dtype-aware sublane rounding) -------------------------
    sub = _sublane_multiple(cdt)
    if B <= block_b:
        # >=2 B tiles (when there is enough real work) so the "parallel" axis
        # can shard across both TensorCores on v7x; costs one extra ~0.35us
        # grid step on single-TC chips.
        n_b = 2 if B >= 2 * sub else 1
        tb = _round_up(_cdiv(B, n_b), sub)
    else:
        tb = _round_up(block_b, sub)
        n_b = _cdiv(B, tb)
    b_p = n_b * tb

    xp = jnp.pad(x, ((0, b_p - B), (0, in_p - in_dim))).astype(cdt)

    budget = _vmem_budget_bytes()

    # Resident-path VMEM estimate: single-buffered weights + double-buffered
    # x / y tiles + the f32 hidden intermediate (and its compute-dtype cast).
    resident_need = (
        itm * (in_p * hid_p + hid_p * out_p)       # resident weights
        + 4 * (hid_p + out_p)                      # biases (f32)
        + 2 * itm * tb * in_p                      # x tiles (double buffered)
        + 2 * out_itm * tb * out_p                 # y tiles (double buffered)
        + (4 + itm) * tb * hid_p                   # h intermediate
    )
    use_tiled = force_hid_tiling or resident_need > budget

    cost = pl.CostEstimate(
        flops=2 * b_p * (in_p * hid_p + hid_p * out_p),
        transcendentals=0,
        bytes_accessed=int(
            itm * b_p * in_p
            + itm * (in_p * hid_p + hid_p * out_p) * (n_b if use_tiled else 1)
            + 4 * (hid_p + out_p)
            + out_itm * b_p * out_p),
    )
    out_shape = jax.ShapeDtypeStruct((b_p, out_p), out_dtype)

    if not use_tiled:
        # ---- weights fully resident in VMEM, grid over B tiles only ----------
        def _run(single_buffer_weights):
            wkw = ({"pipeline_mode": pl.Buffered(1)}
                   if single_buffer_weights else {})
            return pl.pallas_call(
                _mlp_kernel_resident,
                out_shape=out_shape,
                grid_spec=pltpu.PrefetchScalarGridSpec(
                    num_scalar_prefetch=0,
                    grid=(n_b,),
                    in_specs=[
                        pl.BlockSpec((tb, in_p), lambda i: (i, 0)),
                        pl.BlockSpec((in_p, hid_p), lambda i: (0, 0), **wkw),
                        pl.BlockSpec((1, hid_p), lambda i: (0, 0), **wkw),
                        pl.BlockSpec((hid_p, out_p), lambda i: (0, 0), **wkw),
                        pl.BlockSpec((1, out_p), lambda i: (0, 0), **wkw),
                    ],
                    out_specs=pl.BlockSpec((tb, out_p), lambda i: (i, 0)),
                ),
                compiler_params=pltpu.CompilerParams(
                    dimension_semantics=("parallel",),
                    vmem_limit_bytes=budget),
                cost_estimate=cost,
            )(xp, params.w1t, params.b1, params.w2t, params.b2)

        try:
            out_padded = _run(True)
        except Exception:
            # Fallback if this jax build rejects buffer_count=1: default
            # double-buffering is correct, just uses a bit more VMEM.
            out_padded = _run(False)
    else:
        # ---- hid-axis (K) tiling with f32 VMEM accumulator -------------------
        units = hid_p // LANE
        desired = max(LANE, _round_up(min(block_hid, hid_p), LANE))

        def _tiled_need(th):
            return (2 * itm * (in_p * th + th * out_p)   # weight blocks (x2 buf)
                    + 2 * 4 * th + 4 * out_p             # bias blocks
                    + 2 * itm * tb * in_p                # x tiles
                    + 2 * out_itm * tb * out_p           # y tiles
                    + (4 + itm) * tb * th                # h intermediate
                    + 4 * tb * out_p)                    # f32 accumulator

        th = LANE  # always divides hid_p
        for d in sorted((d for d in range(1, units + 1) if units % d == 0),
                        reverse=True):
            cand = d * LANE
            if cand <= desired and _tiled_need(cand) <= budget:
                th = cand
                break
        n_h = hid_p // th

        out_padded = pl.pallas_call(
            _mlp_kernel_hid_tiled,
            out_shape=out_shape,
            grid_spec=pltpu.PrefetchScalarGridSpec(
                num_scalar_prefetch=0,
                grid=(n_b, n_h),
                in_specs=[
                    pl.BlockSpec((tb, in_p), lambda i, k: (i, 0)),
                    pl.BlockSpec((in_p, th), lambda i, k: (0, k)),
                    pl.BlockSpec((1, th), lambda i, k: (0, k)),
                    pl.BlockSpec((th, out_p), lambda i, k: (k, 0)),
                    pl.BlockSpec((1, out_p), lambda i, k: (0, 0)),
                ],
                out_specs=pl.BlockSpec((tb, out_p), lambda i, k: (i, 0)),
                scratch_shapes=[pltpu.VMEM((tb, out_p), jnp.float32)],
            ),
            compiler_params=pltpu.CompilerParams(
                dimension_semantics=("parallel", "arbitrary"),
                vmem_limit_bytes=budget),
            cost_estimate=cost,
        )(xp, params.w1t, params.b1, params.w2t, params.b2)

    return out_padded[:B, :params.out_dim]


def mlp_forward(x, w1, b1, w2, b2, *, compute_dtype=jnp.bfloat16, **kwargs):
    """One-shot convenience wrapper (pads/casts weights on every call).

    Prefer prepare_mlp_params() + mlp_apply() so the weight pad/cast/transpose
    pass over HBM happens once, not per forward call.
    """
    params = prepare_mlp_params(w1, b1, w2, b2, compute_dtype=compute_dtype)
    return mlp_apply(params, x, **kwargs)


if __name__ == "__main__":
    # Small shapes consistent with MLP(in_dim, hid_dim, out_dim)
    B, in_dim, hid_dim, out_dim = 8, 64, 32, 10

    key = jax.random.PRNGKey(0)
    kx, k1, k2, k3, k4 = jax.random.split(key, 5)
    x = jax.random.normal(kx, (B, in_dim), dtype=jnp.float32)
    w1 = jax.random.uniform(k1, (hid_dim, in_dim), jnp.float32, -1.0, 1.0) / jnp.sqrt(in_dim)
    b1 = jax.random.uniform(k2, (hid_dim,), jnp.float32, -1.0, 1.0) / jnp.sqrt(in_dim)
    w2 = jax.random.uniform(k3, (out_dim, hid_dim), jnp.float32, -1.0, 1.0) / jnp.sqrt(hid_dim)
    b2 = jax.random.uniform(k4, (out_dim,), jnp.float32, -1.0, 1.0) / jnp.sqrt(hid_dim)

    ref = jnp.maximum(x @ w1.T + b1, 0.0) @ w2.T + b2

    # 1) f32 compute path (resident weights) -- tight tolerance.
    p_f32 = prepare_mlp_params(w1, b1, w2, b2, compute_dtype=jnp.float32)
    out_f32 = jax.block_until_ready(mlp_apply(p_f32, x))
    assert out_f32.shape == (B, out_dim)
    assert jnp.allclose(out_f32, ref, atol=1e-5, rtol=1e-5)

    # 2) default bf16 MXU path (f32 accumulation) -- bf16-level tolerance.
    p_bf16 = prepare_mlp_params(w1, b1, w2, b2)  # default compute_dtype=bf16
    out_bf16 = jax.block_until_ready(mlp_apply(p_bf16, x))
    assert out_bf16.shape == (B, out_dim)
    assert jnp.allclose(out_bf16, ref, atol=5e-2, rtol=5e-2)

    # 3) hid-axis (K) tiled accumulator path, forced, with 2 B tiles x 2 hid tiles.
    B2, hid2 = 16, 256
    k5, k6, k7, k8, k9 = jax.random.split(jax.random.PRNGKey(1), 5)
    x2 = jax.random.normal(k5, (B2, in_dim), dtype=jnp.float32)
    w1b = jax.random.uniform(k6, (hid2, in_dim), jnp.float32, -1.0, 1.0) / jnp.sqrt(in_dim)
    b1b = jax.random.uniform(k7, (hid2,), jnp.float32, -1.0, 1.0) / jnp.sqrt(in_dim)
    w2b = jax.random.uniform(k8, (out_dim, hid2), jnp.float32, -1.0, 1.0) / jnp.sqrt(hid2)
    b2b = jax.random.uniform(k9, (out_dim,), jnp.float32, -1.0, 1.0) / jnp.sqrt(hid2)
    ref2 = jnp.maximum(x2 @ w1b.T + b1b, 0.0) @ w2b.T + b2b

    p_tiled = prepare_mlp_params(w1b, b1b, w2b, b2b, compute_dtype=jnp.float32)
    out_tiled = jax.block_until_ready(
        mlp_apply(p_tiled, x2, block_hid=128, force_hid_tiling=True))
    assert out_tiled.shape == (B2, out_dim)
    assert jnp.allclose(out_tiled, ref2, atol=1e-4, rtol=1e-4)

    print("KERNEL_OK")
</pallas_src>

<mosaic_0001>
module attributes {stable_mosaic.version = 11 : i64} {
  func.func @_mlp_kernel_resident(%arg0: i32, %arg1: memref<8x128xf32, #tpu.memory_space<vmem>>, %arg2: memref<128x128xf32, #tpu.memory_space<vmem>>, %arg3: memref<1x128xf32, #tpu.memory_space<vmem>>, %arg4: memref<128x128xf32, #tpu.memory_space<vmem>>, %arg5: memref<1x128xf32, #tpu.memory_space<vmem>>, %arg6: memref<8x128xf32, #tpu.memory_space<vmem>>) attributes {dimension_semantics = [#tpu.dimension_semantics<parallel>], iteration_bounds = array<i64: 1>, scalar_prefetch = 0 : i64, scratch_operands = 0 : i64, tpu.core_type = #tpu.core_type<tc>, window_params = [{transform_indices = @transform_0, window_bounds = array<i64: 8, 128>}, {pipeline_mode = #tpu.pipeline_mode<synchronous>, transform_indices = @transform_1, window_bounds = array<i64: 128, 128>}, {pipeline_mode = #tpu.pipeline_mode<synchronous>, transform_indices = @transform_2, window_bounds = array<i64: 1, 128>}, {pipeline_mode = #tpu.pipeline_mode<synchronous>, transform_indices = @transform_3, window_bounds = array<i64: 128, 128>}, {pipeline_mode = #tpu.pipeline_mode<synchronous>, transform_indices = @transform_4, window_bounds = array<i64: 1, 128>}, {transform_indices = @transform_5, window_bounds = array<i64: 8, 128>}]} {
    %c0 = arith.constant 0 : index
    %c0_0 = arith.constant 0 : index
    %0 = vector.load %arg1[%c0, %c0_0] : memref<8x128xf32, #tpu.memory_space<vmem>>, vector<8x128xf32>
    %c0_1 = arith.constant 0 : index
    %c0_2 = arith.constant 0 : index
    %1 = vector.load %arg2[%c0_1, %c0_2] : memref<128x128xf32, #tpu.memory_space<vmem>>, vector<128x128xf32>
    %cst = arith.constant dense<0.000000e+00> : vector<8x128xf32>
    %2 = tpu.matmul %0, %1, %cst {dimension_numbers = #tpu.dot_dimension_numbers<[1], [0], [0], [1], [0, 0, 1, 1], [], []>} : vector<8x128xf32>, vector<128x128xf32>, vector<8x128xf32> -> vector<8x128xf32>
    %c0_3 = arith.constant 0 : index
    %c0_4 = arith.constant 0 : index
    %3 = vector.load %arg3[%c0_3, %c0_4] : memref<1x128xf32, #tpu.memory_space<vmem>>, vector<1x128xf32>
    %4 = vector.broadcast %3 : vector<1x128xf32> to vector<8x128xf32>
    %5 = arith.addf %2, %4 : vector<8x128xf32>
    %cst_5 = arith.constant 0.000000e+00 : f32
    %6 = vector.broadcast %cst_5 : f32 to vector<8x128xf32>
    %7 = arith.maximumf %5, %6 : vector<8x128xf32>
    %c0_6 = arith.constant 0 : index
    %c0_7 = arith.constant 0 : index
    %8 = vector.load %arg4[%c0_6, %c0_7] : memref<128x128xf32, #tpu.memory_space<vmem>>, vector<128x128xf32>
    %cst_8 = arith.constant dense<0.000000e+00> : vector<8x128xf32>
    %9 = tpu.matmul %7, %8, %cst_8 {dimension_numbers = #tpu.dot_dimension_numbers<[1], [0], [0], [1], [0, 0, 1, 1], [], []>} : vector<8x128xf32>, vector<128x128xf32>, vector<8x128xf32> -> vector<8x128xf32>
    %c0_9 = arith.constant 0 : index
    %c0_10 = arith.constant 0 : index
    %10 = vector.load %arg5[%c0_9, %c0_10] : memref<1x128xf32, #tpu.memory_space<vmem>>, vector<1x128xf32>
    %11 = vector.broadcast %10 : vector<1x128xf32> to vector<8x128xf32>
    %12 = arith.addf %9, %11 : vector<8x128xf32>
    %c0_11 = arith.constant 0 : index
    %c0_12 = arith.constant 0 : index
    %13 = vector.load %arg6[%c0_11, %c0_12] : memref<8x128xf32, #tpu.memory_space<vmem>>, vector<8x128xf32>
    tpu.vector_store %arg6[%c0_11, %c0_12], %12 {strides = array<i32>} : memref<8x128xf32, #tpu.memory_space<vmem>>, vector<8x128xf32>,
    return
  }
  func.func @transform_0(%arg0: i32) -> (i32, i32) {
    %c0_i32 = arith.constant 0 : i32
    %c0_i32_0 = arith.constant 0 : i32
    return %arg0, %c0_i32 : i32, i32
  }
  func.func @transform_1(%arg0: i32) -> (i32, i32) {
    %c0_i32 = arith.constant 0 : i32
    %c0_i32_0 = arith.constant 0 : i32
    %c0_i32_1 = arith.constant 0 : i32
    return %c0_i32, %c0_i32_0 : i32, i32
  }
  func.func @transform_2(%arg0: i32) -> (i32, i32) {
    %c0_i32 = arith.constant 0 : i32
    %c0_i32_0 = arith.constant 0 : i32
    %c0_i32_1 = arith.constant 0 : i32
    return %c0_i32, %c0_i32_0 : i32, i32
  }
  func.func @transform_3(%arg0: i32) -> (i32, i32) {
    %c0_i32 = arith.constant 0 : i32
    %c0_i32_0 = arith.constant 0 : i32
    %c0_i32_1 = arith.constant 0 : i32
    return %c0_i32, %c0_i32_0 : i32, i32
  }
  func.func @transform_4(%arg0: i32) -> (i32, i32) {
    %c0_i32 = arith.constant 0 : i32
    %c0_i32_0 = arith.constant 0 : i32
    %c0_i32_1 = arith.constant 0 : i32
    return %c0_i32, %c0_i32_0 : i32, i32
  }
  func.func @transform_5(%arg0: i32) -> (i32, i32) {
    %c0_i32 = arith.constant 0 : i32
    %c0_i32_0 = arith.constant 0 : i32
    return %arg0, %c0_i32 : i32, i32
  }
}

module attributes {stable_mosaic.version = 11 : i64} {
  func.func @_mlp_kernel_resident(%arg0: i32, %arg1: memref<8x128xf32, #tpu.memory_space<vmem>>, %arg2: memref<128x128xf32, #tpu.memory_space<vmem>>, %arg3: memref<1x128xf32, #tpu.memory_space<vmem>>, %arg4: memref<128x128xf32, #tpu.memory_space<vmem>>, %arg5: memref<1x128xf32, #tpu.memory_space<vmem>>, %arg6: memref<8x128xf32, #tpu.memory_space<vmem>>) attributes {dimension_semantics = [#tpu.dimension_semantics<parallel>], iteration_bounds = array<i64: 1>, scalar_prefetch = 0 : i64, scratch_operands = 0 : i64, tpu.core_type = #tpu.core_type<tc>, window_params = [{transform_indices = @transform_0, window_bounds = array<i64: 8, 128>}, {pipeline_mode = #tpu.pipeline_mode<synchronous>, transform_indices = @transform_1, window_bounds = array<i64: 128, 128>}, {pipeline_mode = #tpu.pipeline_mode<synchronous>, transform_indices = @transform_2, window_bounds = array<i64: 1, 128>}, {pipeline_mode = #tpu.pipeline_mode<synchronous>, transform_indices = @transform_3, window_bounds = array<i64: 128, 128>}, {pipeline_mode = #tpu.pipeline_mode<synchronous>, transform_indices = @transform_4, window_bounds = array<i64: 1, 128>}, {transform_indices = @transform_5, window_bounds = array<i64: 8, 128>}]} {
    %c0 = arith.constant 0 : index
    %c0_0 = arith.constant 0 : index
    %0 = vector.load %arg1[%c0, %c0_0] : memref<8x128xf32, #tpu.memory_space<vmem>>, vector<8x128xf32>
    %c0_1 = arith.constant 0 : index
    %c0_2 = arith.constant 0 : index
    %1 = vector.load %arg2[%c0_1, %c0_2] : memref<128x128xf32, #tpu.memory_space<vmem>>, vector<128x128xf32>
    %cst = arith.constant dense<0.000000e+00> : vector<8x128xf32>
    %2 = tpu.matmul %0, %1, %cst {dimension_numbers = #tpu.dot_dimension_numbers<[1], [0], [0], [1], [0, 0, 1, 1], [], []>} : vector<8x128xf32>, vector<128x128xf32>, vector<8x128xf32> -> vector<8x128xf32>
    %c0_3 = arith.constant 0 : index
    %c0_4 = arith.constant 0 : index
    %3 = vector.load %arg3[%c0_3, %c0_4] : memref<1x128xf32, #tpu.memory_space<vmem>>, vector<1x128xf32>
    %4 = vector.broadcast %3 : vector<1x128xf32> to vector<8x128xf32>
    %5 = arith.addf %2, %4 : vector<8x128xf32>
    %cst_5 = arith.constant 0.000000e+00 : f32
    %6 = vector.broadcast %cst_5 : f32 to vector<8x128xf32>
    %7 = arith.maximumf %5, %6 : vector<8x128xf32>
    %c0_6 = arith.constant 0 : index
    %c0_7 = arith.constant 0 : index
    %8 = vector.load %arg4[%c0_6, %c0_7] : memref<128x128xf32, #tpu.memory_space<vmem>>, vector<128x128xf32>
    %cst_8 = arith.constant dense<0.000000e+00> : vector<8x128xf32>
    %9 = tpu.matmul %7, %8, %cst_8 {dimension_numbers = #tpu.dot_dimension_numbers<[1], [0], [0], [1], [0, 0, 1, 1], [], []>} : vector<8x128xf32>, vector<128x128xf32>, vector<8x128xf32> -> vector<8x128xf32>
    %c0_9 = arith.constant 0 : index
    %c0_10 = arith.constant 0 : index
    %10 = vector.load %arg5[%c0_9, %c0_10] : memref<1x128xf32, #tpu.memory_space<vmem>>, vector<1x128xf32>
    %11 = vector.broadcast %10 : vector<1x128xf32> to vector<8x128xf32>
    %12 = arith.addf %9, %11 : vector<8x128xf32>
    %c0_11 = arith.constant 0 : index
    %c0_12 = arith.constant 0 : index
    %13 = vector.load %arg6[%c0_11, %c0_12] : memref<8x128xf32, #tpu.memory_space<vmem>>, vector<8x128xf32>
    tpu.vector_store %arg6[%c0_11, %c0_12], %12 {strides = array<i32>} : memref<8x128xf32, #tpu.memory_space<vmem>>, vector<8x128xf32>,
    return
  }
  func.func @transform_0(%arg0: i32) -> (i32, i32) {
    %c0_i32 = arith.constant 0 : i32
    %c0_i32_0 = arith.constant 0 : i32
    return %arg0, %c0_i32 : i32, i32
  }
  func.func @transform_1(%arg0: i32) -> (i32, i32) {
    %c0_i32 = arith.constant 0 : i32
    %c0_i32_0 = arith.constant 0 : i32
    %c0_i32_1 = arith.constant 0 : i32
    return %c0_i32, %c0_i32_0 : i32, i32
  }
  func.func @transform_2(%arg0: i32) -> (i32, i32) {
    %c0_i32 = arith.constant 0 : i32
    %c0_i32_0 = arith.constant 0 : i32
    %c0_i32_1 = arith.constant 0 : i32
    return %c0_i32, %c0_i32_0 : i32, i32
  }
  func.func @transform_3(%arg0: i32) -> (i32, i32) {
    %c0_i32 = arith.constant 0 : i32
    %c0_i32_0 = arith.constant 0 : i32
    %c0_i32_1 = arith.constant 0 : i32
    return %c0_i32, %c0_i32_0 : i32, i32
  }
  func.func @transform_4(%arg0: i32) -> (i32, i32) {
    %c0_i32 = arith.constant 0 : i32
    %c0_i32_0 = arith.constant 0 : i32
    %c0_i32_1 = arith.constant 0 : i32
    return %c0_i32, %c0_i32_0 : i32, i32
  }
  func.func @transform_5(%arg0: i32) -> (i32, i32) {
    %c0_i32 = arith.constant 0 : i32
    %c0_i32_0 = arith.constant 0 : i32
    return %arg0, %c0_i32 : i32, i32
  }
}

</mosaic_0001>

<bundles_post_ra>
// kernel: tpu_custom_call.1
= control target key start
LH: loop header
LB: loop body
LE: loop exit
PB: predicated region body
PF: predicated region fallthrough
CT: control target
= control target key end

     0   :  { %10 = vsyncpa [#allocation3], 0  ;;  %s555_s0 = inlined_call_operand.hbm [shape: f32[8,128], index: 0, kind: input, shape index: {}]   ;;  %s556_s1 = inlined_call_operand.hbm [shape: f32[128,128], index: 1, kind: input, shape index: {}]   ;;  %s557_s2 = inlined_call_operand.vmem [shape: f32[1,128], index: 2, kind: input, shape index: {}]   ;;  %s558_s3 = inlined_call_operand.hbm [shape: f32[128,128], index: 3, kind: input, shape index: {}]   ;;  %s559_s4 = inlined_call_operand.vmem [shape: f32[1,128], index: 4, kind: input, shape index: {}]   ;;  %s560_s5 = inlined_call_operand.hbm [shape: f32[8,128], index: 5, kind: output, shape index: {}]  }
   0x1   :  { %11 = vsyncpa [#allocation6], 0 }
   0x2   :  { %12 = vsyncpa [#allocation4], 0  ;;  %s465_s18 = smov [#allocation5]  }
   0x3   :  { %s28_s19 = sshll.u32 %s465_s18, 4  ;;  %s29_s19 = int_to_ptr.vmem [resolvable:$true] %s28_s19 }
   0x4   :  { %s387_s20 = scalar_lea.vmem %s29_s19, 2048  ;;  %p392_p1 = scmp.lt.s32.totalorder %s29_s19, %s29_s19 }
   0x5   :  { %p388_p0 = scmp.ne.s32.totalorder %s29_s19, %s387_s20  ;;  %p393_p2 = scmp.lt.s32.totalorder %s387_s20, %s387_s20 }
   0x7   :  { %p394_p3 = por %p393_p2, %p392_p1 }
   0x9   :  { %p395_p4 = pnand %p394_p3, %p388_p0 }
   0xb   :  { %398 = shalt.err (!%p395_p4)
}
   0xc   :  { %s466_s21 = smov 128   ;;  %s467_s22 = smov 8  }
   0xd   :  { %34 = dma.hbm_to_vmem [thread:$0]  %s556_s1, 2048, %s29_s19, [#allocation6], %s466_s21, %s466_s21, %s467_s22  }
   0xe   :  { %s468_s25 = smov [#allocation2]   ;;  %s469_s27 = smov [#allocation7]  }
   0xf   :  { %s19_s26 = sshll.u32 %s468_s25, 4  ;;  %s42_s28 = sshll.u32 %s469_s27, 4  ;;  %s20_s26 = int_to_ptr.vmem [resolvable:$true] %s19_s26  ;;  %s43_s28 = int_to_ptr.vmem [resolvable:$true] %s42_s28 }
  0x10   :  { %s407_s29 = scalar_lea.vmem %s20_s26, 128  ;;  %p412_p6 = scmp.lt.s32.totalorder %s20_s26, %s20_s26 }
  0x11   :  { %p408_p5 = scmp.ne.s32.totalorder %s20_s26, %s407_s29  ;;  %p413_p7 = scmp.lt.s32.totalorder %s407_s29, %s407_s29 }
  0x13   :  { %p414_p8 = por %p413_p7, %p412_p6 }
  0x15   :  { %p415_p9 = pnand %p414_p8, %p408_p5 }
  0x17   :  { %418 = shalt.err (!%p415_p9)
}
  0x18   :  { %22 = dma.hbm_to_vmem [thread:$0]  %s555_s0, 128, %s20_s26, [#allocation3]  }
  0x19   :  { %s427_s7 = scalar_lea.vmem %s43_s28, 2048  ;;  %p432_p11 = scmp.lt.s32.totalorder %s43_s28, %s43_s28 }
  0x1a   :  { %p428_p10 = scmp.ne.s32.totalorder %s43_s28, %s427_s7  ;;  %p433_p12 = scmp.lt.s32.totalorder %s427_s7, %s427_s7 }
  0x1c   :  { %p434_p13 = por %p433_p12, %p432_p11 }
  0x1e   :  { %p435_p0 = pnand %p434_p13, %p428_p10 }
  0x20   :  { %438 = shalt.err (!%p435_p0)
}
  0x21   :  { %48 = dma.hbm_to_vmem [thread:$0]  %s558_s3, 2048, %s43_s28, [#allocation6], %s466_s21, %s466_s21, %s467_s22  }
  0x22   :  { %459 = dma.done.wait [#allocation3], 128  }
  0x23   :  { %460 = vsyncadd [#allocation3], 4294967168 }
  0x24   :  { %461 = dma.done.wait [#allocation6], 4096  }
  0x25   :  { %462 = vsyncadd [#allocation6], 4294963200  ;;  %v470_v0 = vmov 0.0   ;;  %vm471_vm0 = vmmov 0   ;;  %v76_v1 = vld [vmem:[#allocation5 + $0x78] sm:$0xff]  ;;  %v75_v2 = vld [vmem:[#allocation5 + $0x70] sm:$0xff] }
  0x26   :  { %301 = vmatprep.subr.mxu0 %v470_v0  ;;  %333 = vmatprep.mubr.msk.f32.mxu0 %vm471_vm0, %v470_v0  ;;  %v74_v3 = vld [vmem:[#allocation5 + $0x68] sm:$0xff]  ;;  %v73_v4 = vld [vmem:[#allocation5 + $0x60] sm:$0xff]  ;;  %v170_v5 = vld [vmem:[#allocation7 + $0x78] sm:$0xff]  ;;  %s472_s11 = smov [#allocation8]  }
  0x27   :  { %336 = vmatprep.subr.mxu1 %v470_v0  ;;  %368 = vmatprep.mubr.msk.f32.mxu1 %vm471_vm0, %v470_v0  ;;  %v72_v6 = vld [vmem:[#allocation5 + $0x58] sm:$0xff]  ;;  %v169_v7 = vld [vmem:[#allocation7 + $0x70] sm:$0xff]  ;;  %v168_v8 = vld [vmem:[#allocation7 + $0x68] sm:$0xff]  ;;  %s255_s12 = sshll.u32 %s472_s11, 4  ;;  %s256_s12 = int_to_ptr.vmem [resolvable:$true] %s255_s12 }
  0x28   :  { %302 = vmatpush3.msra.mxu0 %v76_v1  ;;  %337 = vmatpush3.msra.mxu1 %v170_v5  ;;  %v71_v9 = vld [vmem:[#allocation5 + $0x50] sm:$0xff]  ;;  %v167_v10 = vld [vmem:[#allocation7 + $0x60] sm:$0xff]  ;;  %v70_v11 = vld [vmem:[#allocation5 + $0x48] sm:$0xff]  ;;  %s439_s13 = scalar_lea.vmem %s256_s12, 128  ;;  %p444_p2 = scmp.lt.s32.totalorder %s256_s12, %s256_s12 }
  0x29   :  { %303 = vmatprep.subr.mxu0 %v470_v0  ;;  %338 = vmatprep.subr.mxu1 %v470_v0  ;;  %v166_v12 = vld [vmem:[#allocation7 + $0x58] sm:$0xff]  ;;  %v69_v13 = vld [vmem:[#allocation5 + $0x40] sm:$0xff]  ;;  %v165_v14 = vld [vmem:[#allocation7 + $0x50] sm:$0xff]  ;;  %p440_p1 = scmp.ne.s32.totalorder %s256_s12, %s439_s13  ;;  %p445_p3 = scmp.lt.s32.totalorder %s439_s13, %s439_s13 }
  0x2a   :  { %304 = vmatpush3.msra.mxu0 %v75_v2  ;;  %339 = vmatpush3.msra.mxu1 %v169_v7  ;;  %v68_v15 = vld [vmem:[#allocation5 + $0x38] sm:$0xff]  ;;  %v164_v16 = vld [vmem:[#allocation7 + $0x48] sm:$0xff]  ;;  %v67_v17 = vld [vmem:[#allocation5 + $0x30] sm:$0xff] }
  0x2b   :  { %305 = vmatprep.subr.mxu0 %v470_v0  ;;  %340 = vmatprep.subr.mxu1 %v470_v0  ;;  %v163_v18 = vld [vmem:[#allocation7 + $0x40] sm:$0xff]  ;;  %v66_v19 = vld [vmem:[#allocation5 + $0x28] sm:$0xff]  ;;  %v162_v20 = vld [vmem:[#allocation7 + $0x38] sm:$0xff]  ;;  %p446_p4 = por %p445_p3, %p444_p2 }
  0x2c   :  { %306 = vmatpush3.msra.mxu0 %v74_v3  ;;  %341 = vmatpush3.msra.mxu1 %v168_v8  ;;  %v65_v21 = vld [vmem:[#allocation5 + $0x20] sm:$0xff]  ;;  %v161_v22 = vld [vmem:[#allocation7 + $0x30] sm:$0xff]  ;;  %v64_v23 = vld [vmem:[#allocation5 + $0x18] sm:$0xff] }
  0x2d   :  { %307 = vmatprep.subr.mxu0 %v470_v0  ;;  %342 = vmatprep.subr.mxu1 %v470_v0  ;;  %v160_v24 = vld [vmem:[#allocation7 + $0x28] sm:$0xff]  ;;  %v63_v25 = vld [vmem:[#allocation5 + $0x10] sm:$0xff]  ;;  %v159_v26 = vld [vmem:[#allocation7 + $0x20] sm:$0xff]  ;;  %p447_p5 = pnand %p446_p4, %p440_p1 }
  0x2e   :  { %308 = vmatpush3.msra.mxu0 %v73_v4  ;;  %343 = vmatpush3.msra.mxu1 %v167_v10  ;;  %v62_v27 = vld [vmem:[#allocation5 + $0x8] sm:$0xff]  ;;  %v158_v28 = vld [vmem:[#allocation7 + $0x18] sm:$0xff]  ;;  %v61_v29 = vld [vmem:[#allocation5] sm:$0xff] }
  0x2f   :  { %309 = vmatprep.subr.mxu0 %v470_v0  ;;  %344 = vmatprep.subr.mxu1 %v470_v0  ;;  %v60_v30 = vld [vmem:[#allocation2] sm:$0xff]  ;;  %v157_v31 = vld [vmem:[#allocation7 + $0x10] sm:$0xff]  ;;  %v156_v32 = vld [vmem:[#allocation7 + $0x8] sm:$0xff] }
  0x30   :  { %310 = vmatpush3.msra.mxu0 %v72_v6  ;;  %345 = vmatpush3.msra.mxu1 %v166_v12  ;;  %v155_v33 = vld [vmem:[#allocation7] sm:$0xff]  ;;  %v265_v34 = vld [vmem:[%s557_s2] ss:$0 sm:$0xff] }
  0x31   :  { %311 = vmatprep.subr.mxu0 %v470_v0  ;;  %346 = vmatprep.subr.mxu1 %v470_v0  ;;  %v266_v39 = vld [vmem:[%s559_s4] ss:$0 sm:$0xff] }
  0x32   :  { %312 = vmatpush3.msra.mxu0 %v71_v9  ;;  %347 = vmatpush3.msra.mxu1 %v165_v14 }
  0x33   :  { %313 = vmatprep.subr.mxu0 %v470_v0  ;;  %348 = vmatprep.subr.mxu1 %v470_v0 }
  0x34   :  { %314 = vmatpush3.msra.mxu0 %v70_v11  ;;  %349 = vmatpush3.msra.mxu1 %v164_v16 }
  0x35   :  { %315 = vmatprep.subr.mxu0 %v470_v0  ;;  %350 = vmatprep.subr.mxu1 %v470_v0 }
  0x36   :  { %316 = vmatpush3.msra.mxu0 %v69_v13  ;;  %351 = vmatpush3.msra.mxu1 %v163_v18 }
  0x37   :  { %317 = vmatprep.subr.mxu0 %v470_v0  ;;  %352 = vmatprep.subr.mxu1 %v470_v0 }
  0x38   :  { %318 = vmatpush3.msra.mxu0 %v68_v15  ;;  %353 = vmatpush3.msra.mxu1 %v162_v20 }
  0x39   :  { %319 = vmatprep.subr.mxu0 %v470_v0  ;;  %354 = vmatprep.subr.mxu1 %v470_v0 }
  0x3a   :  { %320 = vmatpush3.msra.mxu0 %v67_v17  ;;  %355 = vmatpush3.msra.mxu1 %v161_v22 }
  0x3b   :  { %321 = vmatprep.subr.mxu0 %v470_v0  ;;  %356 = vmatprep.subr.mxu1 %v470_v0 }
  0x3c   :  { %322 = vmatpush3.msra.mxu0 %v66_v19  ;;  %357 = vmatpush3.msra.mxu1 %v160_v24 }
  0x3d   :  { %323 = vmatprep.subr.mxu0 %v470_v0  ;;  %358 = vmatprep.subr.mxu1 %v470_v0 }
  0x3e   :  { %324 = vmatpush3.msra.mxu0 %v65_v21  ;;  %359 = vmatpush3.msra.mxu1 %v159_v26 }
  0x3f   :  { %325 = vmatprep.subr.mxu0 %v470_v0  ;;  %360 = vmatprep.subr.mxu1 %v470_v0 }
  0x40   :  { %326 = vmatpush3.msra.mxu0 %v64_v23  ;;  %361 = vmatpush3.msra.mxu1 %v158_v28 }
  0x41   :  { %327 = vmatprep.subr.mxu0 %v470_v0  ;;  %362 = vmatprep.subr.mxu1 %v470_v0 }
  0x42   :  { %328 = vmatpush3.msra.mxu0 %v63_v25  ;;  %363 = vmatpush3.msra.mxu1 %v157_v31 }
  0x43   :  { %329 = vmatprep.subr.mxu0 %v470_v0  ;;  %364 = vmatprep.subr.mxu1 %v470_v0 }
  0x44   :  { %330 = vmatpush3.msra.mxu0 %v62_v27  ;;  %365 = vmatpush3.msra.mxu1 %v156_v32 }
  0x45   :  { %331 = vmatprep.subr.mxu0 %v470_v0  ;;  %366 = vmatprep.subr.mxu1 %v470_v0 }
  0x46   :  { %332 = vmatpush3.msra.mxu0 %v61_v29  ;;  %367 = vmatpush3.msra.mxu1 %v155_v33 }
  0x47   :  { %334 = vmatmul.mubr.f32.vlgmr.msra.gmra.mxu0 %v60_v30 }
 0x107   :  { %v150_v35 = vpop.f32.mrf.mxu0 }
 0x108   :  { %v151_v36 = vadd.f32 %v265_v34, %v150_v35 }
 0x109   :  { %v335_v37 = vpop.f32.mrf.mxu0 }
 0x10a   :  { %v154_v38 = vmax.f32 %v151_v36, 0.0 }
 0x10c   :  { %369 = vmatmul.mubr.f32.vlgmr.msra.gmra.mxu1 %v154_v38 }
 0x1cc   :  { %v244_v40 = vpop.f32.mrf.mxu1 }
 0x1cd   :  { %v245_v41 = vadd.f32 %v266_v39, %v244_v40 }
 0x1ce   :  { %v370_v42 = vpop.f32.mrf.mxu1 }
 0x1cf   :  { %248 = vst [vmem:[#allocation8] sm:$0xff] %v245_v41 }
 0x1d0   :  { %450 = shalt.err (!%p447_p5)
}
 0x1d1   :  { %258 = dma.vmem_to_hbm [thread:$0]  %s256_s12, 128, %s560_s5, [#allocation4]  }
 0x1d2   :  { %463 = dma.done.wait [#allocation4], 128  }
 0x1d3   :  { %464 = vsyncadd [#allocation4], 4294967168 }
 0x1d4   :  { %262 = vsyncpa [#allocation3], 1 }
 0x1d5   :  { %263 = vsyncpa [#allocation6], 1 }
 0x1d6   :  { %264 = vsyncpa [#allocation4], 1 }

// kernel: tpu_custom_call.1
= control target key start
LH: loop header
LB: loop body
LE: loop exit
PB: predicated region body
PF: predicated region fallthrough
CT: control target
= control target key end

     0   :  { %10 = vsyncpa [#allocation3], 0  ;;  %s555_s0 = inlined_call_operand.hbm [shape: f32[8,128], index: 0, kind: input, shape index: {}]   ;;  %s556_s1 = inlined_call_operand.hbm [shape: f32[128,128], index: 1, kind: input, shape index: {}]   ;;  %s557_s2 = inlined_call_operand.vmem [shape: f32[1,128], index: 2, kind: input, shape index: {}]   ;;  %s558_s3 = inlined_call_operand.hbm [shape: f32[128,128], index: 3, kind: input, shape index: {}]   ;;  %s559_s4 = inlined_call_operand.vmem [shape: f32[1,128], index: 4, kind: input, shape index: {}]   ;;  %s560_s5 = inlined_call_operand.hbm [shape: f32[8,128], index: 5, kind: output, shape index: {}]  }
   0x1   :  { %11 = vsyncpa [#allocation6], 0 }
   0x2   :  { %12 = vsyncpa [#allocation4], 0  ;;  %s465_s18 = smov [#allocation5]  }
   0x3   :  { %s28_s19 = sshll.u32 %s465_s18, 4  ;;  %s29_s19 = int_to_ptr.vmem [resolvable:$true] %s28_s19 }
   0x4   :  { %s387_s20 = scalar_lea.vmem %s29_s19, 2048  ;;  %p392_p1 = scmp.lt.s32.totalorder %s29_s19, %s29_s19 }
   0x5   :  { %p388_p0 = scmp.ne.s32.totalorder %s29_s19, %s387_s20  ;;  %p393_p2 = scmp.lt.s32.totalorder %s387_s20, %s387_s20 }
   0x7   :  { %p394_p3 = por %p393_p2, %p392_p1 }
   0x9   :  { %p395_p4 = pnand %p394_p3, %p388_p0 }
   0xb   :  { %398 = shalt.err (!%p395_p4)
}
   0xc   :  { %s466_s21 = smov 128   ;;  %s467_s22 = smov 8  }
   0xd   :  { %34 = dma.hbm_to_vmem [thread:$0]  %s556_s1, 2048, %s29_s19, [#allocation6], %s466_s21, %s466_s21, %s467_s22  }
   0xe   :  { %s468_s25 = smov [#allocation2]   ;;  %s469_s27 = smov [#allocation7]  }
   0xf   :  { %s19_s26 = sshll.u32 %s468_s25, 4  ;;  %s42_s28 = sshll.u32 %s469_s27, 4  ;;  %s20_s26 = int_to_ptr.vmem [resolvable:$true] %s19_s26  ;;  %s43_s28 = int_to_ptr.vmem [resolvable:$true] %s42_s28 }
  0x10   :  { %s407_s29 = scalar_lea.vmem %s20_s26, 128  ;;  %p412_p6 = scmp.lt.s32.totalorder %s20_s26, %s20_s26 }
  0x11   :  { %p408_p5 = scmp.ne.s32.totalorder %s20_s26, %s407_s29  ;;  %p413_p7 = scmp.lt.s32.totalorder %s407_s29, %s407_s29 }
  0x13   :  { %p414_p8 = por %p413_p7, %p412_p6 }
  0x15   :  { %p415_p9 = pnand %p414_p8, %p408_p5 }
  0x17   :  { %418 = shalt.err (!%p415_p9)
}
  0x18   :  { %22 = dma.hbm_to_vmem [thread:$0]  %s555_s0, 128, %s20_s26, [#allocation3]  }
  0x19   :  { %s427_s7 = scalar_lea.vmem %s43_s28, 2048  ;;  %p432_p11 = scmp.lt.s32.totalorder %s43_s28, %s43_s28 }
  0x1a   :  { %p428_p10 = scmp.ne.s32.totalorder %s43_s28, %s427_s7  ;;  %p433_p12 = scmp.lt.s32.totalorder %s427_s7, %s427_s7 }
  0x1c   :  { %p434_p13 = por %p433_p12, %p432_p11 }
  0x1e   :  { %p435_p0 = pnand %p434_p13, %p428_p10 }
  0x20   :  { %438 = shalt.err (!%p435_p0)
}
  0x21   :  { %48 = dma.hbm_to_vmem [thread:$0]  %s558_s3, 2048, %s43_s28, [#allocation6], %s466_s21, %s466_s21, %s467_s22  }
  0x22   :  { %459 = dma.done.wait [#allocation3], 128  }
  0x23   :  { %460 = vsyncadd [#allocation3], 4294967168 }
  0x24   :  { %461 = dma.done.wait [#allocation6], 4096  }
  0x25   :  { %462 = vsyncadd [#allocation6], 4294963200  ;;  %v470_v0 = vmov 0.0   ;;  %vm471_vm0 = vmmov 0   ;;  %v76_v1 = vld [vmem:[#allocation5 + $0x78] sm:$0xff]  ;;  %v75_v2 = vld [vmem:[#allocation5 + $0x70] sm:$0xff] }
  0x26   :  { %301 = vmatprep.subr.mxu0 %v470_v0  ;;  %333 = vmatprep.mubr.msk.f32.mxu0 %vm471_vm0, %v470_v0  ;;  %v74_v3 = vld [vmem:[#allocation5 + $0x68] sm:$0xff]  ;;  %v73_v4 = vld [vmem:[#allocation5 + $0x60] sm:$0xff]  ;;  %v170_v5 = vld [vmem:[#allocation7 + $0x78] sm:$0xff]  ;;  %s472_s11 = smov [#allocation8]  }
  0x27   :  { %336 = vmatprep.subr.mxu1 %v470_v0  ;;  %368 = vmatprep.mubr.msk.f32.mxu1 %vm471_vm0, %v470_v0  ;;  %v72_v6 = vld [vmem:[#allocation5 + $0x58] sm:$0xff]  ;;  %v169_v7 = vld [vmem:[#allocation7 + $0x70] sm:$0xff]  ;;  %v168_v8 = vld [vmem:[#allocation7 + $0x68] sm:$0xff]  ;;  %s255_s12 = sshll.u32 %s472_s11, 4  ;;  %s256_s12 = int_to_ptr.vmem [resolvable:$true] %s255_s12 }
  0x28   :  { %302 = vmatpush3.msra.mxu0 %v76_v1  ;;  %337 = vmatpush3.msra.mxu1 %v170_v5  ;;  %v71_v9 = vld [vmem:[#allocation5 + $0x50] sm:$0xff]  ;;  %v167_v10 = vld [vmem:[#allocation7 + $0x60] sm:$0xff]  ;;  %v70_v11 = vld [vmem:[#allocation5 + $0x48] sm:$0xff]  ;;  %s439_s13 = scalar_lea.vmem %s256_s12, 128  ;;  %p444_p2 = scmp.lt.s32.totalorder %s256_s12, %s256_s12 }
  0x29   :  { %303 = vmatprep.subr.mxu0 %v470_v0  ;;  %338 = vmatprep.subr.mxu1 %v470_v0  ;;  %v166_v12 = vld [vmem:[#allocation7 + $0x58] sm:$0xff]  ;;  %v69_v13 = vld [vmem:[#allocation5 + $0x40] sm:$0xff]  ;;  %v165_v14 = vld [vmem:[#allocation7 + $0x50] sm:$0xff]  ;;  %p440_p1 = scmp.ne.s32.totalorder %s256_s12, %s439_s13  ;;  %p445_p3 = scmp.lt.s32.totalorder %s439_s13, %s439_s13 }
  0x2a   :  { %304 = vmatpush3.msra.mxu0 %v75_v2  ;;  %339 = vmatpush3.msra.mxu1 %v169_v7  ;;  %v68_v15 = vld [vmem:[#allocation5 + $0x38] sm:$0xff]  ;;  %v164_v16 = vld [vmem:[#allocation7 + $0x48] sm:$0xff]  ;;  %v67_v17 = vld [vmem:[#allocation5 + $0x30] sm:$0xff] }
  0x2b   :  { %305 = vmatprep.subr.mxu0 %v470_v0  ;;  %340 = vmatprep.subr.mxu1 %v470_v0  ;;  %v163_v18 = vld [vmem:[#allocation7 + $0x40] sm:$0xff]  ;;  %v66_v19 = vld [vmem:[#allocation5 + $0x28] sm:$0xff]  ;;  %v162_v20 = vld [vmem:[#allocation7 + $0x38] sm:$0xff]  ;;  %p446_p4 = por %p445_p3, %p444_p2 }
  0x2c   :  { %306 = vmatpush3.msra.mxu0 %v74_v3  ;;  %341 = vmatpush3.msra.mxu1 %v168_v8  ;;  %v65_v21 = vld [vmem:[#allocation5 + $0x20] sm:$0xff]  ;;  %v161_v22 = vld [vmem:[#allocation7 + $0x30] sm:$0xff]  ;;  %v64_v23 = vld [vmem:[#allocation5 + $0x18] sm:$0xff] }
  0x2d   :  { %307 = vmatprep.subr.mxu0 %v470_v0  ;;  %342 = vmatprep.subr.mxu1 %v470_v0  ;;  %v160_v24 = vld [vmem:[#allocation7 + $0x28] sm:$0xff]  ;;  %v63_v25 = vld [vmem:[#allocation5 + $0x10] sm:$0xff]  ;;  %v159_v26 = vld [vmem:[#allocation7 + $0x20] sm:$0xff]  ;;  %p447_p5 = pnand %p446_p4, %p440_p1 }
  0x2e   :  { %308 = vmatpush3.msra.mxu0 %v73_v4  ;;  %343 = vmatpush3.msra.mxu1 %v167_v10  ;;  %v62_v27 = vld [vmem:[#allocation5 + $0x8] sm:$0xff]  ;;  %v158_v28 = vld [vmem:[#allocation7 + $0x18] sm:$0xff]  ;;  %v61_v29 = vld [vmem:[#allocation5] sm:$0xff] }
  0x2f   :  { %309 = vmatprep.subr.mxu0 %v470_v0  ;;  %344 = vmatprep.subr.mxu1 %v470_v0  ;;  %v60_v30 = vld [vmem:[#allocation2] sm:$0xff]  ;;  %v157_v31 = vld [vmem:[#allocation7 + $0x10] sm:$0xff]  ;;  %v156_v32 = vld [vmem:[#allocation7 + $0x8] sm:$0xff] }
  0x30   :  { %310 = vmatpush3.msra.mxu0 %v72_v6  ;;  %345 = vmatpush3.msra.mxu1 %v166_v12  ;;  %v155_v33 = vld [vmem:[#allocation7] sm:$0xff]  ;;  %v265_v34 = vld [vmem:[%s557_s2] ss:$0 sm:$0xff] }
  0x31   :  { %311 = vmatprep.subr.mxu0 %v470_v0  ;;  %346 = vmatprep.subr.mxu1 %v470_v0  ;;  %v266_v39 = vld [vmem:[%s559_s4] ss:$0 sm:$0xff] }
  0x32   :  { %312 = vmatpush3.msra.mxu0 %v71_v9  ;;  %347 = vmatpush3.msra.mxu1 %v165_v14 }
  0x33   :  { %313 = vmatprep.subr.mxu0 %v470_v0  ;;  %348 = vmatprep.subr.mxu1 %v470_v0 }
  0x34   :  { %314 = vmatpush3.msra.mxu0 %v70_v11  ;;  %349 = vmatpush3.msra.mxu1 %v164_v16 }
  0x35   :  { %315 = vmatprep.subr.mxu0 %v470_v0  ;;  %350 = vmatprep.subr.mxu1 %v470_v0 }
  0x36   :  { %316 = vmatpush3.msra.mxu0 %v69_v13  ;;  %351 = vmatpush3.msra.mxu1 %v163_v18 }
  0x37   :  { %317 = vmatprep.subr.mxu0 %v470_v0  ;;  %352 = vmatprep.subr.mxu1 %v470_v0 }
  0x38   :  { %318 = vmatpush3.msra.mxu0 %v68_v15  ;;  %353 = vmatpush3.msra.mxu1 %v162_v20 }
  0x39   :  { %319 = vmatprep.subr.mxu0 %v470_v0  ;;  %354 = vmatprep.subr.mxu1 %v470_v0 }
  0x3a   :  { %320 = vmatpush3.msra.mxu0 %v67_v17  ;;  %355 = vmatpush3.msra.mxu1 %v161_v22 }
  0x3b   :  { %321 = vmatprep.subr.mxu0 %v470_v0  ;;  %356 = vmatprep.subr.mxu1 %v470_v0 }
  0x3c   :  { %322 = vmatpush3.msra.mxu0 %v66_v19  ;;  %357 = vmatpush3.msra.mxu1 %v160_v24 }
  0x3d   :  { %323 = vmatprep.subr.mxu0 %v470_v0  ;;  %358 = vmatprep.subr.mxu1 %v470_v0 }
  0x3e   :  { %324 = vmatpush3.msra.mxu0 %v65_v21  ;;  %359 = vmatpush3.msra.mxu1 %v159_v26 }
  0x3f   :  { %325 = vmatprep.subr.mxu0 %v470_v0  ;;  %360 = vmatprep.subr.mxu1 %v470_v0 }
  0x40   :  { %326 = vmatpush3.msra.mxu0 %v64_v23  ;;  %361 = vmatpush3.msra.mxu1 %v158_v28 }
  0x41   :  { %327 = vmatprep.subr.mxu0 %v470_v0  ;;  %362 = vmatprep.subr.mxu1 %v470_v0 }
  0x42   :  { %328 = vmatpush3.msra.mxu0 %v63_v25  ;;  %363 = vmatpush3.msra.mxu1 %v157_v31 }
  0x43   :  { %329 = vmatprep.subr.mxu0 %v470_v0  ;;  %364 = vmatprep.subr.mxu1 %v470_v0 }
  0x44   :  { %330 = vmatpush3.msra.mxu0 %v62_v27  ;;  %365 = vmatpush3.msra.mxu1 %v156_v32 }
  0x45   :  { %331 = vmatprep.subr.mxu0 %v470_v0  ;;  %366 = vmatprep.subr.mxu1 %v470_v0 }
  0x46   :  { %332 = vmatpush3.msra.mxu0 %v61_v29  ;;  %367 = vmatpush3.msra.mxu1 %v155_v33 }
  0x47   :  { %334 = vmatmul.mubr.f32.vlgmr.msra.gmra.mxu0 %v60_v30 }
 0x107   :  { %v150_v35 = vpop.f32.mrf.mxu0 }
 0x108   :  { %v151_v36 = vadd.f32 %v265_v34, %v150_v35 }
 0x109   :  { %v335_v37 = vpop.f32.mrf.mxu0 }
 0x10a   :  { %v154_v38 = vmax.f32 %v151_v36, 0.0 }
 0x10c   :  { %369 = vmatmul.mubr.f32.vlgmr.msra.gmra.mxu1 %v154_v38 }
 0x1cc   :  { %v244_v40 = vpop.f32.mrf.mxu1 }
 0x1cd   :  { %v245_v41 = vadd.f32 %v266_v39, %v244_v40 }
 0x1ce   :  { %v370_v42 = vpop.f32.mrf.mxu1 }
 0x1cf   :  { %248 = vst [vmem:[#allocation8] sm:$0xff] %v245_v41 }
 0x1d0   :  { %450 = shalt.err (!%p447_p5)
}
 0x1d1   :  { %258 = dma.vmem_to_hbm [thread:$0]  %s256_s12, 128, %s560_s5, [#allocation4]  }
 0x1d2   :  { %463 = dma.done.wait [#allocation4], 128  }
 0x1d3   :  { %464 = vsyncadd [#allocation4], 4294967168 }
 0x1d4   :  { %262 = vsyncpa [#allocation3], 1 }
 0x1d5   :  { %263 = vsyncpa [#allocation6], 1 }
 0x1d6   :  { %264 = vsyncpa [#allocation4], 1 }

</bundles_post_ra>
